<compile_context>
chip_gen: v5e
topology: v5e:2x2
jax: 0.10.0
libtpu: 0.0.40
codegen_flags: <defaults>
</compile_context>

<pallas_src>
import math

import jax
import jax.numpy as jnp
from jax.experimental import pallas as pl
from jax.experimental.pallas import tpu as pltpu

_INV_SQRT2 = 0.7071067811865476


def _erf_approx(x):
    # TODO(synk): lax.erf (exact nn.GELU) has no Pallas-TPU lowering; use
    # Abramowitz & Stegun 7.1.26 (max abs err ~1.5e-7, below the 1e-4 check).
    a1, a2, a3, a4, a5 = (0.254829592, -0.284496736, 1.421413741,
                          -1.453152027, 1.061405429)
    p = 0.3275911
    ax = jnp.abs(x)
    # NOTE: exact divide kept (not pl.reciprocal(approx=True)) so accuracy vs the
    # exact-erf reference is guaranteed; the kernel is launch/DMA-overhead bound
    # at these sizes so the EUP offload would not be measurable anyway.
    t = 1.0 / (1.0 + p * ax)
    poly = ((((a5 * t + a4) * t + a3) * t + a2) * t + a1) * t
    y = 1.0 - poly * jnp.exp(-ax * ax)
    return jnp.where(x < 0.0, -y, y)


def _gelu_kernel(x):
    # exact (erf-based) GELU, matching torch.nn.GELU() default
    return 0.5 * x * (1.0 + _erf_approx(x * _INV_SQRT2))


def _gelu_ref(x):
    return 0.5 * x * (1.0 + jax.scipy.special.erf(x * _INV_SQRT2))


# --------------------------------------------------------------------------- kernel
def _fused_levels_kernel(low0_ref, high_ref, w1_ref, b1_ref, csel_ref, b2_ref,
                         mw1_ref, mb1_ref, mw2_ref, mb2_ref, out_ref, carry_ref):
    ut = pl.program_id(0)       # user tile (parallel axis)
    lv = pl.program_id(1)       # mixing level (sequential carry axis)

    @pl.when(lv == 0)
    def _():
        carry_ref[ut] = low0_ref[...]          # seed the carried out_low

    low = carry_ref[ut]                         # (S, UbH) current out_low

    # Batched ragged up-sampling: all S per-position layers in one matmul.
    # rows of w1/b1 are flattened (j, k); csel[j, j*S+k] = c2[j, k].
    y = jnp.dot(w1_ref[0], low, preferred_element_type=jnp.float32) + b1_ref[0]
    g = _gelu_kernel(y)                                             # (S*S, UbH)
    res = jnp.dot(csel_ref[0], g, preferred_element_type=jnp.float32) + b2_ref[0]

    mixed = high_ref[0] + res                                       # (S, UbH)

    # Shared hidden->hidden MLP, block-diagonal over the folded user lanes
    # (no relayout needed; weights are VMEM-resident across all levels).
    h1 = _gelu_kernel(jnp.dot(mixed, mw1_ref[...],
                              preferred_element_type=jnp.float32) + mb1_ref[...])
    out = jnp.dot(h1, mw2_ref[...],
                  preferred_element_type=jnp.float32) + mb2_ref[...]

    out_ref[0] = out
    carry_ref[ut] = out                          # becomes out_low of next level


# --------------------------------------------------------------------------- wrapper
def _fold(x):                                    # (U, S, H) -> lane-dense (S, U*H)
    U, S, H = x.shape
    return jnp.transpose(x, (1, 0, 2)).reshape(S, U * H)


def _unfold(y, U, H):                            # (S, U*H) -> (U, S, H)
    S = y.shape[0]
    return jnp.transpose(y.reshape(S, U, H), (1, 0, 2))


def _choose_user_block(U, H):
    # Split users into two tiles when blocks stay 128-lane aligned, so the
    # parallel user-tile axis can shard across v7x's 2 TensorCores.
    if U % 2 == 0 and ((U // 2) * H) % 128 == 0:
        return U // 2
    return U


def multiscale_trend_mixing(trend_list, params):
    L = len(trend_list)
    if L < 2:
        return list(trend_list)
    rev = list(reversed(trend_list))
    U, S, H = rev[0].shape
    u_blk = _choose_user_block(U, H)
    n_ut = U // u_blk
    ubh = u_blk * H

    low0_f = _fold(rev[0])                                               # (S, U*H)
    high_f = jnp.stack([_fold(rev[i + 1]) for i in range(L - 1)], 0)     # (L-1, S, U*H)

    # Kernel-side weight layouts (built once, wrapper-side -> free layout plumbing).
    w1f = params["upW1"].reshape(L - 1, S * S, S)          # rows flattened (j, k)
    b1c = params["upb1"].reshape(L - 1, S * S, 1)
    b2c = params["upb2"].reshape(L - 1, S, 1)
    # TODO(synk): b1c/b2c are lane-1 columns (pad to 128 lanes in VMEM); negligible
    # at S=8, fold into an augmented matmul for large S.
    csel = (params["upc"][:, :, None, :]
            * jnp.eye(S, dtype=jnp.float32)[None, :, :, None]).reshape(L - 1, S, S * S)
    # TODO(synk): for large S, tile the flattened (j,k) axis into the grid (or exploit
    # the triangular structure) instead of staging the O(S^3) padded W1 per level in
    # VMEM (v7x only has 64 MiB).  TODO(synk): bf16 matmul inputs once not overhead-bound.

    eye_u = jnp.eye(u_blk, dtype=jnp.float32)
    mw1bd = jnp.kron(eye_u, params["mw1t"])                # (ubh, ubh) block-diagonal
    mw2bd = jnp.kron(eye_u, params["mw2t"])
    mb1t = jnp.tile(params["mb1"], (1, u_blk))             # (1, ubh)
    mb2t = jnp.tile(params["mb2"], (1, u_blk))

    outs_f = pl.pallas_call(
        _fused_levels_kernel,
        out_shape=jax.ShapeDtypeStruct((L - 1, S, U * H), jnp.float32),
        grid_spec=pltpu.PrefetchScalarGridSpec(
            num_scalar_prefetch=0,
            grid=(n_ut, L - 1),                  # (parallel user tiles, carried levels)
            in_specs=[
                pl.BlockSpec((S, ubh), lambda ut, l: (0, ut)),          # initial out_low
                pl.BlockSpec((1, S, ubh), lambda ut, l: (l, 0, ut)),    # out_high per level
                pl.BlockSpec((1, S * S, S), lambda ut, l: (l, 0, 0)),   # batched W1
                pl.BlockSpec((1, S * S, 1), lambda ut, l: (l, 0, 0)),   # batched b1
                pl.BlockSpec((1, S, S * S), lambda ut, l: (l, 0, 0)),   # selection / W2
                pl.BlockSpec((1, S, 1), lambda ut, l: (l, 0, 0)),       # b2
                pl.BlockSpec((ubh, ubh), lambda ut, l: (0, 0)),         # MLP W1 (resident)
                pl.BlockSpec((1, ubh), lambda ut, l: (0, 0)),
                pl.BlockSpec((ubh, ubh), lambda ut, l: (0, 0)),         # MLP W2 (resident)
                pl.BlockSpec((1, ubh), lambda ut, l: (0, 0)),
            ],
            out_specs=pl.BlockSpec((1, S, ubh), lambda ut, l: (l, 0, ut)),
            scratch_shapes=[pltpu.VMEM((n_ut, S, ubh), jnp.float32)],   # out_low carry
        ),
        compiler_params=pltpu.CompilerParams(
            dimension_semantics=("parallel", "arbitrary")),
    )(low0_f, high_f, w1f, b1c, csel, b2c, mw1bd, mb1t, mw2bd, mb2t)

    outs = [rev[0]] + [_unfold(outs_f[i], U, H) for i in range(L - 1)]
    outs.reverse()
    return outs


# --------------------------------------------------------------------------- params / reference
def init_params(key, hidden_size, seq_len, quadkey_level):
    S, H, L = seq_len, hidden_size, quadkey_level
    ks = jax.random.split(key, 8)
    # mask[j, s] = 1 iff s <= j (valid positions for the j-th up-sampling layer)
    mask = (jnp.arange(S)[None, :] <= jnp.arange(S)[:, None]).astype(jnp.float32)

    upW1 = jax.random.uniform(ks[0], (L - 1, S, S, S), minval=-0.35, maxval=0.35)
    upW1 = upW1 * mask[None, :, :, None] * mask[None, :, None, :]   # [l, j, out k, in s]
    upb1 = jax.random.uniform(ks[1], (L - 1, S, S), minval=-0.35, maxval=0.35) * mask[None]
    upc = jax.random.uniform(ks[2], (L - 1, S, S), minval=-0.35, maxval=0.35) * mask[None]
    upb2 = jax.random.uniform(ks[3], (L - 1, S), minval=-0.35, maxval=0.35)

    lim = 1.0 / math.sqrt(H)
    mw1t = jax.random.uniform(ks[4], (H, H), minval=-lim, maxval=lim)   # W1.T (in, out)
    mb1 = jax.random.uniform(ks[5], (1, H), minval=-lim, maxval=lim)
    mw2t = jax.random.uniform(ks[6], (H, H), minval=-lim, maxval=lim)   # W2.T (in, out)
    mb2 = jax.random.uniform(ks[7], (1, H), minval=-lim, maxval=lim)
    return dict(upW1=upW1, upb1=upb1, upc=upc, upb2=upb2,
                mw1t=mw1t, mb1=mb1, mw2t=mw2t, mb2=mb2)


def multiscale_trend_mixing_ref(trend_list, params):
    # Pure-JAX mirror of the PyTorch forward (uses the unpadded weight slices).
    rev = list(reversed(trend_list))
    out_low, out_high = rev[0], rev[1]
    outs = [out_low]
    n = len(rev)
    for i in range(n - 1):
        U, S, H = out_high.shape
        rows = []
        for j in range(S):
            xp = jnp.transpose(out_low[:, :j + 1, :], (0, 2, 1))      # (U, H, j+1)
            W1 = params["upW1"][i, j, :j + 1, :j + 1]
            b1 = params["upb1"][i, j, :j + 1]
            w2 = params["upc"][i, j, :j + 1]
            b2 = params["upb2"][i, j]
            y = jnp.einsum('uhs,ts->uht', xp, W1) + b1
            z = jnp.einsum('uht,t->uh', _gelu_ref(y), w2) + b2
            rows.append(z)
        res = jnp.stack(rows, axis=1)                                  # (U, S, H)
        mixed = out_high + res
        out_low = (_gelu_ref(mixed @ params["mw1t"] + params["mb1"])
                   @ params["mw2t"] + params["mb2"])
        outs.append(out_low)
        if i + 2 <= n - 1:
            out_high = rev[i + 2]
    outs.reverse()
    return outs


if __name__ == "__main__":
    hidden_size, seq_len, quadkey_level, user_len = 32, 8, 3, 8
    key = jax.random.PRNGKey(0)
    kp, kx = jax.random.split(key)
    params = init_params(kp, hidden_size, seq_len, quadkey_level)
    xkeys = jax.random.split(kx, quadkey_level)
    trend_list = [0.5 * jax.random.normal(xkeys[l], (user_len, seq_len, hidden_size),
                                          dtype=jnp.float32)
                  for l in range(quadkey_level)]

    outs = multiscale_trend_mixing(trend_list, params)
    outs = [jax.block_until_ready(o) for o in outs]

    refs = multiscale_trend_mixing_ref(trend_list, params)
    for o, r in zip(outs, refs):
        assert o.shape == r.shape and o.dtype == r.dtype
        err = float(jnp.max(jnp.abs(o - r)))
        if err > 1e-4:
            raise AssertionError(f"mismatch vs reference: max abs err {err}")
    print("KERNEL_OK")
</pallas_src>

<mosaic_0001>
module attributes {stable_mosaic.version = 11 : i64} {
  func.func @_fused_levels_kernel(%arg0: i32, %arg1: i32, %arg2: memref<8x128xf32, #tpu.memory_space<vmem>>, %arg3: memref<1x8x128xf32, #tpu.memory_space<vmem>>, %arg4: memref<1x64x8xf32, #tpu.memory_space<vmem>>, %arg5: memref<1x64x1xf32, #tpu.memory_space<vmem>>, %arg6: memref<1x8x64xf32, #tpu.memory_space<vmem>>, %arg7: memref<1x8x1xf32, #tpu.memory_space<vmem>>, %arg8: memref<128x128xf32, #tpu.memory_space<vmem>>, %arg9: memref<1x128xf32, #tpu.memory_space<vmem>>, %arg10: memref<128x128xf32, #tpu.memory_space<vmem>>, %arg11: memref<1x128xf32, #tpu.memory_space<vmem>>, %arg12: memref<1x8x128xf32, #tpu.memory_space<vmem>>, %arg13: memref<2x8x128xf32, #tpu.memory_space<vmem>>) attributes {dimension_semantics = [#tpu.dimension_semantics<parallel>, #tpu.dimension_semantics<arbitrary>], iteration_bounds = array<i64: 2, 2>, scalar_prefetch = 0 : i64, scratch_operands = 1 : i64, tpu.core_type = #tpu.core_type<tc>, window_params = [{transform_indices = @transform_0, window_bounds = array<i64: 8, 128>}, {transform_indices = @transform_1, window_bounds = array<i64: 1, 8, 128>}, {transform_indices = @transform_2, window_bounds = array<i64: 1, 64, 8>}, {transform_indices = @transform_3, window_bounds = array<i64: 1, 64, 1>}, {transform_indices = @transform_4, window_bounds = array<i64: 1, 8, 64>}, {transform_indices = @transform_5, window_bounds = array<i64: 1, 8, 1>}, {pipeline_mode = #tpu.pipeline_mode<synchronous>, transform_indices = @transform_6, window_bounds = array<i64: 128, 128>}, {pipeline_mode = #tpu.pipeline_mode<synchronous>, transform_indices = @transform_7, window_bounds = array<i64: 1, 128>}, {pipeline_mode = #tpu.pipeline_mode<synchronous>, transform_indices = @transform_8, window_bounds = array<i64: 128, 128>}, {pipeline_mode = #tpu.pipeline_mode<synchronous>, transform_indices = @transform_9, window_bounds = array<i64: 1, 128>}, {transform_indices = @transform_10, window_bounds = array<i64: 1, 8, 128>}]} {
    %c0_i32 = arith.constant 0 : i32
    %0 = arith.cmpi eq, %arg1, %c0_i32 : i32
    %1 = arith.extui %0 : i1 to i32
    %c0_i32_0 = arith.constant 0 : i32
    %2 = arith.cmpi ne, %1, %c0_i32_0 : i32
    scf.if %2 {
      %c0_63 = arith.constant 0 : index
      %c0_64 = arith.constant 0 : index
      %120 = vector.load %arg2[%c0_63, %c0_64] : memref<8x128xf32, #tpu.memory_space<vmem>>, vector<8x128xf32>
      %121 = arith.index_cast %arg0 : i32 to index
      %c0_65 = arith.constant 0 : index
      %c0_66 = arith.constant 0 : index
      %122 = vector.load %arg13[%121, %c0_65, %c0_66] : memref<2x8x128xf32, #tpu.memory_space<vmem>>, vector<1x8x128xf32>
      %123 = vector.shape_cast %122 : vector<1x8x128xf32> to vector<8x128xf32>
      %124 = vector.shape_cast %120 : vector<8x128xf32> to vector<1x8x128xf32>
      tpu.vector_store %arg13[%121, %c0_65, %c0_66], %124 {strides = array<i32>} : memref<2x8x128xf32, #tpu.memory_space<vmem>>, vector<1x8x128xf32>,
    } else {
    }
    %3 = arith.index_cast %arg0 : i32 to index
    %c0 = arith.constant 0 : index
    %c0_1 = arith.constant 0 : index
    %4 = vector.load %arg13[%3, %c0, %c0_1] : memref<2x8x128xf32, #tpu.memory_space<vmem>>, vector<1x8x128xf32>
    %5 = vector.shape_cast %4 : vector<1x8x128xf32> to vector<8x128xf32>
    %c0_2 = arith.constant 0 : index
    %c0_3 = arith.constant 0 : index
    %c0_4 = arith.constant 0 : index
    %6 = vector.load %arg4[%c0_2, %c0_3, %c0_4] : memref<1x64x8xf32, #tpu.memory_space<vmem>>, vector<1x64x8xf32>
    %7 = vector.shape_cast %6 : vector<1x64x8xf32> to vector<64x8xf32>
    %cst = arith.constant dense<0.000000e+00> : vector<64x128xf32>
    %8 = tpu.matmul %7, %5, %cst {dimension_numbers = #tpu.dot_dimension_numbers<[1], [0], [0], [1], [0, 0, 1, 1], [], []>} : vector<64x8xf32>, vector<8x128xf32>, vector<64x128xf32> -> vector<64x128xf32>
    %c0_5 = arith.constant 0 : index
    %c0_6 = arith.constant 0 : index
    %c0_7 = arith.constant 0 : index
    %9 = vector.load %arg5[%c0_5, %c0_6, %c0_7] : memref<1x64x1xf32, #tpu.memory_space<vmem>>, vector<1x64x1xf32>
    %10 = vector.shape_cast %9 : vector<1x64x1xf32> to vector<64x1xf32>
    %11 = vector.broadcast %10 : vector<64x1xf32> to vector<64x128xf32>
    %12 = arith.addf %8, %11 : vector<64x128xf32>
    %cst_8 = arith.constant 5.000000e-01 : f32
    %13 = vector.broadcast %cst_8 : f32 to vector<64x128xf32>
    %14 = arith.mulf %13, %12 : vector<64x128xf32>
    %cst_9 = arith.constant 0.707106769 : f32
    %15 = vector.broadcast %cst_9 : f32 to vector<64x128xf32>
    %16 = arith.mulf %12, %15 : vector<64x128xf32>
    %17 = math.absf %16 : vector<64x128xf32>
    %cst_10 = arith.constant 0.327591091 : f32
    %18 = vector.broadcast %cst_10 : f32 to vector<64x128xf32>
    %19 = arith.mulf %18, %17 : vector<64x128xf32>
    %cst_11 = arith.constant 1.000000e+00 : f32
    %20 = vector.broadcast %cst_11 : f32 to vector<64x128xf32>
    %21 = arith.addf %20, %19 : vector<64x128xf32>
    %cst_12 = arith.constant 1.000000e+00 : f32
    %22 = vector.broadcast %cst_12 : f32 to vector<64x128xf32>
    %23 = arith.divf %22, %21 : vector<64x128xf32>
    %cst_13 = arith.constant 1.06140542 : f32
    %24 = vector.broadcast %cst_13 : f32 to vector<64x128xf32>
    %25 = arith.mulf %24, %23 : vector<64x128xf32>
    %cst_14 = arith.constant -1.45315206 : f32
    %26 = vector.broadcast %cst_14 : f32 to vector<64x128xf32>
    %27 = arith.addf %25, %26 : vector<64x128xf32>
    %28 = arith.mulf %27, %23 : vector<64x128xf32>
    %cst_15 = arith.constant 1.42141378 : f32
    %29 = vector.broadcast %cst_15 : f32 to vector<64x128xf32>
    %30 = arith.addf %28, %29 : vector<64x128xf32>
    %31 = arith.mulf %30, %23 : vector<64x128xf32>
    %cst_16 = arith.constant -0.284496725 : f32
    %32 = vector.broadcast %cst_16 : f32 to vector<64x128xf32>
    %33 = arith.addf %31, %32 : vector<64x128xf32>
    %34 = arith.mulf %33, %23 : vector<64x128xf32>
    %cst_17 = arith.constant 0.254829586 : f32
    %35 = vector.broadcast %cst_17 : f32 to vector<64x128xf32>
    %36 = arith.addf %34, %35 : vector<64x128xf32>
    %37 = arith.mulf %36, %23 : vector<64x128xf32>
    %cst_18 = arith.constant 0.000000e+00 : f32
    %38 = vector.broadcast %cst_18 : f32 to vector<64x128xf32>
    %39 = arith.subf %38, %17 : vector<64x128xf32>
    %40 = arith.mulf %39, %17 : vector<64x128xf32>
    %41 = math.exp %40 : vector<64x128xf32>
    %42 = arith.mulf %37, %41 : vector<64x128xf32>
    %cst_19 = arith.constant 1.000000e+00 : f32
    %43 = vector.broadcast %cst_19 : f32 to vector<64x128xf32>
    %44 = arith.subf %43, %42 : vector<64x128xf32>
    %cst_20 = arith.constant 0.000000e+00 : f32
    %45 = vector.broadcast %cst_20 : f32 to vector<64x128xf32>
    %46 = arith.cmpf olt, %16, %45 : vector<64x128xf32>
    %cst_21 = arith.constant 0.000000e+00 : f32
    %47 = vector.broadcast %cst_21 : f32 to vector<64x128xf32>
    %48 = arith.subf %47, %44 : vector<64x128xf32>
    %49 = arith.select %46, %48, %44 : vector<64x128xi1>, vector<64x128xf32>
    %cst_22 = arith.constant 1.000000e+00 : f32
    %50 = vector.broadcast %cst_22 : f32 to vector<64x128xf32>
    %51 = arith.addf %50, %49 : vector<64x128xf32>
    %52 = arith.mulf %14, %51 : vector<64x128xf32>
    %c0_23 = arith.constant 0 : index
    %c0_24 = arith.constant 0 : index
    %c0_25 = arith.constant 0 : index
    %53 = vector.load %arg6[%c0_23, %c0_24, %c0_25] : memref<1x8x64xf32, #tpu.memory_space<vmem>>, vector<1x8x64xf32>
    %54 = vector.shape_cast %53 : vector<1x8x64xf32> to vector<8x64xf32>
    %cst_26 = arith.constant dense<0.000000e+00> : vector<8x128xf32>
    %55 = tpu.matmul %54, %52, %cst_26 {dimension_numbers = #tpu.dot_dimension_numbers<[1], [0], [0], [1], [0, 0, 1, 1], [], []>} : vector<8x64xf32>, vector<64x128xf32>, vector<8x128xf32> -> vector<8x128xf32>
    %c0_27 = arith.constant 0 : index
    %c0_28 = arith.constant 0 : index
    %c0_29 = arith.constant 0 : index
    %56 = vector.load %arg7[%c0_27, %c0_28, %c0_29] : memref<1x8x1xf32, #tpu.memory_space<vmem>>, vector<1x8x1xf32>
    %57 = vector.shape_cast %56 : vector<1x8x1xf32> to vector<8x1xf32>
    %58 = vector.broadcast %57 : vector<8x1xf32> to vector<8x128xf32>
    %59 = arith.addf %55, %58 : vector<8x128xf32>
    %c0_30 = arith.constant 0 : index
    %c0_31 = arith.constant 0 : index
    %c0_32 = arith.constant 0 : index
    %60 = vector.load %arg3[%c0_30, %c0_31, %c0_32] : memref<1x8x128xf32, #tpu.memory_space<vmem>>, vector<1x8x128xf32>
    %61 = vector.shape_cast %60 : vector<1x8x128xf32> to vector<8x128xf32>
    %62 = arith.addf %61, %59 : vector<8x128xf32>
    %c0_33 = arith.constant 0 : index
    %c0_34 = arith.constant 0 : index
    %63 = vector.load %arg8[%c0_33, %c0_34] : memref<128x128xf32, #tpu.memory_space<vmem>>, vector<128x128xf32>
    %cst_35 = arith.constant dense<0.000000e+00> : vector<8x128xf32>
    %64 = tpu.matmul %62, %63, %cst_35 {dimension_numbers = #tpu.dot_dimension_numbers<[1], [0], [0], [1], [0, 0, 1, 1], [], []>} : vector<8x128xf32>, vector<128x128xf32>, vector<8x128xf32> -> vector<8x128xf32>
    %c0_36 = arith.constant 0 : index
    %c0_37 = arith.constant 0 : index
    %65 = vector.load %arg9[%c0_36, %c0_37] : memref<1x128xf32, #tpu.memory_space<vmem>>, vector<1x128xf32>
    %66 = vector.broadcast %65 : vector<1x128xf32> to vector<8x128xf32>
    %67 = arith.addf %64, %66 : vector<8x128xf32>
    %cst_38 = arith.constant 5.000000e-01 : f32
    %68 = vector.broadcast %cst_38 : f32 to vector<8x128xf32>
    %69 = arith.mulf %68, %67 : vector<8x128xf32>
    %cst_39 = arith.constant 0.707106769 : f32
    %70 = vector.broadcast %cst_39 : f32 to vector<8x128xf32>
    %71 = arith.mulf %67, %70 : vector<8x128xf32>
    %72 = math.absf %71 : vector<8x128xf32>
    %cst_40 = arith.constant 0.327591091 : f32
    %73 = vector.broadcast %cst_40 : f32 to vector<8x128xf32>
    %74 = arith.mulf %73, %72 : vector<8x128xf32>
    %cst_41 = arith.constant 1.000000e+00 : f32
    %75 = vector.broadcast %cst_41 : f32 to vector<8x128xf32>
    %76 = arith.addf %75, %74 : vector<8x128xf32>
    %cst_42 = arith.constant 1.000000e+00 : f32
    %77 = vector.broadcast %cst_42 : f32 to vector<8x128xf32>
    %78 = arith.divf %77, %76 : vector<8x128xf32>
    %cst_43 = arith.constant 1.06140542 : f32
    %79 = vector.broadcast %cst_43 : f32 to vector<8x128xf32>
    %80 = arith.mulf %79, %78 : vector<8x128xf32>
    %cst_44 = arith.constant -1.45315206 : f32
    %81 = vector.broadcast %cst_44 : f32 to vector<8x128xf32>
    %82 = arith.addf %80, %81 : vector<8x128xf32>
    %83 = arith.mulf %82, %78 : vector<8x128xf32>
    %cst_45 = arith.constant 1.42141378 : f32
    %84 = vector.broadcast %cst_45 : f32 to vector<8x128xf32>
    %85 = arith.addf %83, %84 : vector<8x128xf32>
    %86 = arith.mulf %85, %78 : vector<8x128xf32>
    %cst_46 = arith.constant -0.284496725 : f32
    %87 = vector.broadcast %cst_46 : f32 to vector<8x128xf32>
    %88 = arith.addf %86, %87 : vector<8x128xf32>
    %89 = arith.mulf %88, %78 : vector<8x128xf32>
    %cst_47 = arith.constant 0.254829586 : f32
    %90 = vector.broadcast %cst_47 : f32 to vector<8x128xf32>
    %91 = arith.addf %89, %90 : vector<8x128xf32>
    %92 = arith.mulf %91, %78 : vector<8x128xf32>
    %cst_48 = arith.constant 0.000000e+00 : f32
    %93 = vector.broadcast %cst_48 : f32 to vector<8x128xf32>
    %94 = arith.subf %93, %72 : vector<8x128xf32>
    %95 = arith.mulf %94, %72 : vector<8x128xf32>
    %96 = math.exp %95 : vector<8x128xf32>
    %97 = arith.mulf %92, %96 : vector<8x128xf32>
    %cst_49 = arith.constant 1.000000e+00 : f32
    %98 = vector.broadcast %cst_49 : f32 to vector<8x128xf32>
    %99 = arith.subf %98, %97 : vector<8x128xf32>
    %cst_50 = arith.constant 0.000000e+00 : f32
    %100 = vector.broadcast %cst_50 : f32 to vector<8x128xf32>
    %101 = arith.cmpf olt, %71, %100 : vector<8x128xf32>
    %cst_51 = arith.constant 0.000000e+00 : f32
    %102 = vector.broadcast %cst_51 : f32 to vector<8x128xf32>
    %103 = arith.subf %102, %99 : vector<8x128xf32>
    %104 = arith.select %101, %103, %99 : vector<8x128xi1>, vector<8x128xf32>
    %cst_52 = arith.constant 1.000000e+00 : f32
    %105 = vector.broadcast %cst_52 : f32 to vector<8x128xf32>
    %106 = arith.addf %105, %104 : vector<8x128xf32>
    %107 = arith.mulf %69, %106 : vector<8x128xf32>
    %c0_53 = arith.constant 0 : index
    %c0_54 = arith.constant 0 : index
    %108 = vector.load %arg10[%c0_53, %c0_54] : memref<128x128xf32, #tpu.memory_space<vmem>>, vector<128x128xf32>
    %cst_55 = arith.constant dense<0.000000e+00> : vector<8x128xf32>
    %109 = tpu.matmul %107, %108, %cst_55 {dimension_numbers = #tpu.dot_dimension_numbers<[1], [0], [0], [1], [0, 0, 1, 1], [], []>} : vector<8x128xf32>, vector<128x128xf32>, vector<8x128xf32> -> vector<8x128xf32>
    %c0_56 = arith.constant 0 : index
    %c0_57 = arith.constant 0 : index
    %110 = vector.load %arg11[%c0_56, %c0_57] : memref<1x128xf32, #tpu.memory_space<vmem>>, vector<1x128xf32>
    %111 = vector.broadcast %110 : vector<1x128xf32> to vector<8x128xf32>
    %112 = arith.addf %109, %111 : vector<8x128xf32>
    %c0_58 = arith.constant 0 : index
    %c0_59 = arith.constant 0 : index
    %c0_60 = arith.constant 0 : index
    %113 = vector.load %arg12[%c0_58, %c0_59, %c0_60] : memref<1x8x128xf32, #tpu.memory_space<vmem>>, vector<1x8x128xf32>
    %114 = vector.shape_cast %113 : vector<1x8x128xf32> to vector<8x128xf32>
    %115 = vector.shape_cast %112 : vector<8x128xf32> to vector<1x8x128xf32>
    tpu.vector_store %arg12[%c0_58, %c0_59, %c0_60], %115 {strides = array<i32>} : memref<1x8x128xf32, #tpu.memory_space<vmem>>, vector<1x8x128xf32>,
    %116 = arith.index_cast %arg0 : i32 to index
    %c0_61 = arith.constant 0 : index
    %c0_62 = arith.constant 0 : index
    %117 = vector.load %arg13[%116, %c0_61, %c0_62] : memref<2x8x128xf32, #tpu.memory_space<vmem>>, vector<1x8x128xf32>
    %118 = vector.shape_cast %117 : vector<1x8x128xf32> to vector<8x128xf32>
    %119 = vector.shape_cast %112 : vector<8x128xf32> to vector<1x8x128xf32>
    tpu.vector_store %arg13[%116, %c0_61, %c0_62], %119 {strides = array<i32>} : memref<2x8x128xf32, #tpu.memory_space<vmem>>, vector<1x8x128xf32>,
    return
  }
  func.func @transform_0(%arg0: i32, %arg1: i32) -> (i32, i32) {
    %c0_i32 = arith.constant 0 : i32
    %c0_i32_0 = arith.constant 0 : i32
    return %c0_i32, %arg0 : i32, i32
  }
  func.func @transform_1(%arg0: i32, %arg1: i32) -> (i32, i32, i32) {
    %c0_i32 = arith.constant 0 : i32
    %c0_i32_0 = arith.constant 0 : i32
    return %arg1, %c0_i32, %arg0 : i32, i32, i32
  }
  func.func @transform_2(%arg0: i32, %arg1: i32) -> (i32, i32, i32) {
    %c0_i32 = arith.constant 0 : i32
    %c0_i32_0 = arith.constant 0 : i32
    %c0_i32_1 = arith.constant 0 : i32
    return %arg1, %c0_i32, %c0_i32_0 : i32, i32, i32
  }
  func.func @transform_3(%arg0: i32, %arg1: i32) -> (i32, i32, i32) {
    %c0_i32 = arith.constant 0 : i32
    %c0_i32_0 = arith.constant 0 : i32
    %c0_i32_1 = arith.constant 0 : i32
    return %arg1, %c0_i32, %c0_i32_0 : i32, i32, i32
  }
  func.func @transform_4(%arg0: i32, %arg1: i32) -> (i32, i32, i32) {
    %c0_i32 = arith.constant 0 : i32
    %c0_i32_0 = arith.constant 0 : i32
    %c0_i32_1 = arith.constant 0 : i32
    return %arg1, %c0_i32, %c0_i32_0 : i32, i32, i32
  }
  func.func @transform_5(%arg0: i32, %arg1: i32) -> (i32, i32, i32) {
    %c0_i32 = arith.constant 0 : i32
    %c0_i32_0 = arith.constant 0 : i32
    %c0_i32_1 = arith.constant 0 : i32
    return %arg1, %c0_i32, %c0_i32_0 : i32, i32, i32
  }
  func.func @transform_6(%arg0: i32, %arg1: i32) -> (i32, i32) {
    %c0_i32 = arith.constant 0 : i32
    %c0_i32_0 = arith.constant 0 : i32
    %c0_i32_1 = arith.constant 0 : i32
    return %c0_i32, %c0_i32_0 : i32, i32
  }
  func.func @transform_7(%arg0: i32, %arg1: i32) -> (i32, i32) {
    %c0_i32 = arith.constant 0 : i32
    %c0_i32_0 = arith.constant 0 : i32
    %c0_i32_1 = arith.constant 0 : i32
    return %c0_i32, %c0_i32_0 : i32, i32
  }
  func.func @transform_8(%arg0: i32, %arg1: i32) -> (i32, i32) {
    %c0_i32 = arith.constant 0 : i32
    %c0_i32_0 = arith.constant 0 : i32
    %c0_i32_1 = arith.constant 0 : i32
    return %c0_i32, %c0_i32_0 : i32, i32
  }
  func.func @transform_9(%arg0: i32, %arg1: i32) -> (i32, i32) {
    %c0_i32 = arith.constant 0 : i32
    %c0_i32_0 = arith.constant 0 : i32
    %c0_i32_1 = arith.constant 0 : i32
    return %c0_i32, %c0_i32_0 : i32, i32
  }
  func.func @transform_10(%arg0: i32, %arg1: i32) -> (i32, i32, i32) {
    %c0_i32 = arith.constant 0 : i32
    %c0_i32_0 = arith.constant 0 : i32
    return %arg1, %c0_i32, %arg0 : i32, i32, i32
  }
}

</mosaic_0001>

<bundles_post_ra>
// kernel: tpu_custom_call.1
= control target key start
LH: loop header
LB: loop body
LE: loop exit
PB: predicated region body
PF: predicated region fallthrough
CT: control target
= control target key end

     0   :  { %s2436_s0 = inlined_call_operand.vmem [shape: f32[8,256], index: 0, kind: input, shape index: {}]   ;;  %s2437_s1 = inlined_call_operand.hbm [shape: f32[2,8,256], index: 1, kind: input, shape index: {}]   ;;  %s2438_s2 = inlined_call_operand.vmem [shape: f32[2,64,8], index: 2, kind: input, shape index: {}]   ;;  %s2439_s3 = inlined_call_operand.vmem [shape: f32[2,64,1], index: 3, kind: input, shape index: {}]   ;;  %s2440_s4 = inlined_call_operand.hbm [shape: f32[2,8,64], index: 4, kind: input, shape index: {}]   ;;  %s2441_s5 = inlined_call_operand.vmem [shape: f32[2,8,1], index: 5, kind: input, shape index: {}]   ;;  %s2442_s6 = inlined_call_operand.vmem [shape: f32[128,128], index: 6, kind: input, shape index: {}]   ;;  %s2443_s7 = inlined_call_operand.vmem [shape: f32[1,128], index: 7, kind: input, shape index: {}]   ;;  %s2444_s8 = inlined_call_operand.vmem [shape: f32[128,128], index: 8, kind: input, shape index: {}]   ;;  %s2445_s9 = inlined_call_operand.vmem [shape: f32[1,128], index: 9, kind: input, shape index: {}]   ;;  %s2446_s10 = inlined_call_operand.hbm [shape: f32[2,8,256], index: 10, kind: output, shape index: {}]  }
   0x1   :  { %2460 = sst [smem:[#allocation22_spill]] %s2437_s1 }
   0x2   :  { %2461 = sst [smem:[#allocation23_spill]] %s2440_s4 }
   0x3   :  { %2462 = sst [smem:[#allocation24_spill]] %s2442_s6 }
   0x4   :  { %2463 = sst [smem:[#allocation25_spill]] %s2443_s7 }
   0x5   :  { %2464 = sst [smem:[#allocation26_spill]] %s2444_s8 }
   0x6   :  { %2465 = sst [smem:[#allocation27_spill]] %s2445_s9 }
   0x7   :  { %2466 = sst [smem:[#allocation28_spill]] %s2446_s10 }
   0x8   :  { %15 = vsyncpa [#allocation4], 0 }
   0x9   :  { %17 = vsyncpa [#allocation4 + $0x1], 0 }
   0xa   :  { %18 = vsyncpa [#allocation7], 0 }
   0xb   :  { %20 = vsyncpa [#allocation7 + $0x1], 0 }
   0xc   :  { %21 = vsyncpa [#allocation5], 0 }
   0xd   :  { %23 = vsyncpa [#allocation5 + $0x1], 0  ;;  %s1726_s13 = smov 0   ;;  %s1728_s14 = smov 0  }
   0xe   :  { %s1730_s15 = smov 0   ;;  %s1732_s16 = smov 0  }
   0xf   :  { %s1734_s17 = smov 0   ;;  %s1736_s18 = smov 0  }
  0x10   :  { %s1738_s19 = smov 0   ;;  %s1740_s20 = smov 0  }
  0x11   :  { %s1742_s21 = smov 0   ;;  %s1744_s22 = smov 0  }
  0x12   :  { %s1746_s23 = smov 0  }
  0x13 LB: > { %2467 = sst [smem:[#allocation12_spill]] %s1640_s16  ;;  %s1294_s24 = sadd.s32 4294967295, %s1668_s23   ;;  %s1668_s23 = sphi %s1746_s23, %s29_s23   ;;  %s1664_s22 = sphi %s1744_s22, %s2520_s22   ;;  %s1660_s21 = sphi %s1742_s21, %s2519_s21   ;;  %s1656_s20 = sphi %s1740_s20, %s2518_s20   ;;  %s1652_s19 = sphi %s1738_s19, %s2517_s19   ;;  %s1648_s18 = sphi %s1736_s18, %s2516_s18   ;;  %s1644_s17 = sphi %s1734_s17, %s2515_s17   ;;  %s1640_s16 = sphi %s1732_s16, %s2514_s16   ;;  %s1636_s15 = sphi %s1730_s15, %s2523_s15   ;;  %s1632_s14 = sphi %s1728_s14, %s2522_s14   ;;  %s1628_s13 = sphi %s1726_s13, %s2521_s13  }
  0x14   : > { %2468 = sst [smem:[#allocation13_spill]] %s1644_s17  ;;  %s1295_s25 = sadd.s32 4294967294, %s1668_s23  }
  0x15   : > { %2469 = sst [smem:[#allocation14_spill]] %s1648_s18  ;;  %s38_s26 = sadd.s32 1, %s1660_s21 }
  0x16   : > { %2470 = sst [smem:[#allocation15_spill]] %s1660_s21  ;;  %s41_s27 = sadd.s32 1, %s1664_s22 }
  0x17   : > { %2471 = sst [smem:[#allocation16_spill]] %s1664_s22  ;;  %p39_p0 = scmp.ge.s32.totalorder %s38_s26, 2 }
  0x18   : > { %s76_s28 = sadd.s32 1, %s1648_s18  ;;  %p83_p1 = scmp.ne.s32.totalorder %s1648_s18, %s1644_s17 }
  0x19   : > { %p84_p2 = scmp.eq.s32.totalorder %s1668_s23, 0  ;;  %s2525_s26 = smov (%p39_p0, %s38_s26), 0 }
  0x1a   : > { %2472 = sst [smem:[#allocation17_spill]] %s2525_s26  ;;  %s2527_s27 = smov (!%p39_p0, %s41_s27), %s1664_s22 }
  0x1b   : > { %s1794_s29 = ssub.s32 %s1660_s21, %s2525_s26  ;;  %p1801_p3 = por %p84_p2, %p83_p1 }
  0x1c   : > { %p43_p4 = scmp.ge.s32.totalorder %s2527_s27, 2  ;;  %p89_p5 = scmp.ne.s32.totalorder %s1644_s17, %s1640_s16 }
  0x1d   : > { %p1807_p6 = scmp.eq.s32.totalorder %s1294_s24, 0  ;;  %p152_p7 = scmp.eq.s32.totalorder %s1794_s29, 0 }
  0x1e   : > { %s2529_s27 = smov (%p43_p4, %s2527_s27), 0  ;;  %p303_p9 = scmp.eq.s32.totalorder %s1294_s24, 3 }
  0x1f   : > { %2475 = sst [smem:[#allocation18_spill]] %s2529_s27  ;;  %p1816_p8 = por %p1807_p6, %p89_p5 }
  0x20   : > { %s72_s26 = ssub.s32 %s1664_s22, %s2529_s27  ;;  %p309_p10 = scmp.eq.s32.totalorder %s1295_s25, 3 }
  0x21   : > { %s73_s9 = sor.u32 %s72_s26, %s1794_s29  ;;  %p1826_p11 = por %p303_p9, %p83_p1 }
  0x22   : > { %p74_p12 = scmp.eq.s32.totalorder %s73_s9, 0  ;;  %p1830_p13 = por %p309_p10, %p89_p5 }
  0x23   : > { %s2477_s16 = scalar_select %p1826_p11, 1, 0 }
  0x24   : > { %s2479_s10 = scalar_select %p1830_p13, 1, 0 }
  0x25   : > { %2478 = sst [smem:[#allocation19_spill]] %s2477_s16  ;;  %p1350_p0 = scmp.lt.s32.totalorder %s1668_s23, 4 }
  0x26   : > { %2480 = sst [smem:[#allocation20_spill]] %s2479_s10  ;;  %s348_s24 = sand.u32 1, %s1648_s18  }
  0x27   : > { %s1836_s7 = scalar_select %p74_p12, %s1648_s18, %s76_s28  }
  0x28   : > { %s1299_s25 = sshll.u32 %s1660_s21, 1  ;;  %s1298_s26 = sshll.u32 %s348_s24, 3 }
  0x29   : > { %2481 = sst [smem:[#allocation21_spill]] %s1836_s7  ;;  %s356_s27 = sadd.s32 %s1664_s22, %s1299_s25 }
  0x2a   : > { %s1300_s16 = sshll.u32 %s356_s27, 3  ;;  %s352_s9 = scalar_lea.vmem [#allocation3], %s1298_s26 }
  0x2b   : > { %s362_s8 = sshll.u32 %s352_s9, 4  ;;  %s2482_s1 = sld [smem:[#allocation22_spill]]  ;;  %s363_s8 = int_to_ptr.vmem [resolvable:$true] %s362_s8 }
  0x2c   : > { %p1340_p1 = pnand %p1350_p0, %p1801_p3  ;;  %p1303_p4 = scmp.ge.s32.totalorder %s1668_s23, 1 }
  0x2d   : > { %p409_p5 = scmp.lt.s32.totalorder %s1668_s23, 5  ;;  %s349_s27 = scalar_lea.sflag [#allocation4], %s348_s24 }
  0x2e   : > { %s154_s6 = sadd.s32 1, %s1636_s15  ;;  %p161_p10 = scmp.ne.s32.totalorder %s1636_s15, %s1632_s14 }
  0x2f   : > { %p1850_p9 = pnand %p1303_p4, %p409_p5  ;;  %p167_p12 = scmp.ne.s32.totalorder %s1632_s14, %s1628_s13 }
  0x30   : > { %s1858_s10 = scalar_select %p152_p7, %s1636_s15, %s154_s6  }
  0x31   : > { %s358_s28 = scalar_lea.hbm %s2482_s1, %s1300_s16  ;;  %s385_s16 = sand.u32 1, %s1636_s15  }
  0x32   : > { %s360_s7 = sshll.u32 %s358_s28, 4  ;;  %s1302_s30 = sshll.u32 %s1660_s21, 3  ;;  %s361_s7 = int_to_ptr.hbm [resolvable:$true] %s360_s7 }
  0x33   : > { %1342 = dma.hbm_to_vmem [thread:$0]  (!%p1340_p1), %s361_s7, 128, %s363_s8, %s349_s27  }
  0x34   : > { %p1868_p3 = por %p167_p12, %p1807_p6  ;;  %p163_p1 = por %p161_p10, %p84_p2 }
  0x35   : > { %s1301_s7 = sshll.u32 %s385_s16, 3  ;;  %s2485_s4 = sld [smem:[#allocation23_spill]] }
  0x36   : > { %s389_s29 = scalar_lea.vmem [#allocation6], %s1301_s7  ;;  %p1343_p7 = pnand %p1350_p0, %p163_p1 }
  0x37   : > { %s397_s27 = sshll.u32 %s389_s29, 4  ;;  %s386_s13 = scalar_lea.sflag [#allocation7], %s385_s16  ;;  %s398_s27 = int_to_ptr.vmem [resolvable:$true] %s397_s27 }
  0x38   : > { %s1882_s11 = sand.u32 (!%p1850_p9), 1, %s1644_s17  }
  0x39   : > { %413 = sbr.rel (%p1850_p9) target bundleno = 768 (0x300), region = 60  ;;  %s1304_s6 = sshll.u32 (!%p1850_p9), %s1882_s11, 3 }
  0x3a   : > { %s1886_s8 = scalar_lea.vmem (!%p1850_p9), [#allocation3], %s1304_s6 }
  0x3b   : > { %s393_s9 = scalar_lea.hbm %s2485_s4, %s1302_s30  ;;  %s416_s30 = scalar_lea.sflag (!%p1850_p9), [#allocation4], %s1882_s11 }
  0x3c   : > { %s395_s28 = sshll.u32 %s393_s9, 4  ;;  %s396_s28 = int_to_ptr.hbm [resolvable:$true] %s395_s28 }
  0x3d   : > { %1345 = dma.hbm_to_vmem [thread:$0]  (!%p1343_p7), %s396_s28, 128, %s398_s27, %s386_s13  }
  0x3e   : > { %1615 = dma.done.wait (%p1816_p8), %s416_s30, 128  }
  0x3f   : > { %1617 = vsyncadd (%p1816_p8), %s416_s30, 4294967168  ;;  %s425_s16 = sand.u32 1, %s1632_s14  }
  0x40   : > { %s1893_s25 = sshll.u32 %s425_s16, 3  ;;  %s426_s7 = scalar_lea.sflag [#allocation7], %s425_s16 }
  0x41   : > { %1619 = dma.done.wait (%p1868_p3), %s426_s7, 128  }
  0x42   : > { %1621 = vsyncadd (%p1868_p3), %s426_s7, 4294967168  ;;  %p490_p2 = scmp.lt.s32.totalorder %s1656_s20, 1  ;;  %p494_p6 = scmp.lt.s32.totalorder %s1652_s19, 1 }
  0x43   : > { %s1922_s17 = scalar_lea.vmem [#allocation8], %s1304_s6  ;;  %p1313_p8 = scmp.ne.s32.totalorder %s1652_s19, 0 }
  0x44   : > { %s491_s12 = scalar_select %p490_p2, %s1656_s20, 1 }
  0x45   : > { %s495_s9 = scalar_select %p494_p6, %s1652_s19, 1 }
  0x46   : > { %s1307_s28 = sshll.u32 %s491_s12, 3  ;;  %511 = sbr.rel (%p1313_p8) target bundleno = 77 (0x4d), region = 72 }
  0x47   : > { %s493_s13 = scalar_lea.vmem %s2436_s0, %s1307_s28  ;;  %s1330_s30 = sshll.u32 %s495_s9, 6 }
  0x48   : > { %s1910_s1 = scalar_lea.vmem %s2438_s2, %s1330_s30  ;;  %s1915_s4 = scalar_lea.vmem %s2439_s3, %s1330_s30 }
  0x49   : > { %s1312_s22 = sshll.u32 %s495_s9, 3  ;;  %s1314_s24 = sshll.u32 (!%p1313_p8), %s1656_s20, 3 }
  0x4a   : > { %s1920_s12 = scalar_lea.vmem %s2441_s5, %s1312_s22  ;;  %s514_s28 = scalar_lea.vmem (!%p1313_p8), [#allocation2], %s1314_s24 }
  0x4b   : > { %v512_v0 = vld [vmem:[%s493_s13] sm:$0xff] }
  0x4c   : > { %515 = vst [vmem:[%s514_s28] sm:$0xff] %v512_v0 }
  0x4d PF: > { %v532_v1 = vld [vmem:[%s1915_s4 + $0x28] sm:$0xff]  ;;  %s1315_s18 = sshll.u32 %s1656_s20, 3  ;;  %v1670_v2 = vmov 0   ;;  %v519_v3 = vld [vmem:[%s1910_s1] sm:$0xff]  ;;  %vm575_vm0 = vcmask 64512   ;;  %v534_v5 = vld [vmem:[%s1915_s4 + $0x38] sm:$0xff] }
  0x4e   : > { %1442 = vset.pattern.permute.xlu1 %v1670_v2  ;;  %v524_v4 = vld [vmem:[%s1910_s1 + $0x28] sm:$0xff]  ;;  %1441 = vset.pattern.permute.xlu0 %v1670_v2  ;;  %s1931_s21 = scalar_lea.vmem [#allocation2], %s1315_s18  ;;  %v530_v7 = vld [vmem:[%s1915_s4 + $0x18] sm:$0xff]  ;;  %v531_v8 = vld [vmem:[%s1915_s4 + $0x20] sm:$0xff]  ;;  %s2504_s22 = sld [smem:[#allocation24_spill]] }
  0x4f   : > { %562 = vperm.xlu1 %1442, %v532_v1   ;;  %572 = vperm.xlu0 %1441, %v534_v5   ;;  %v533_v9 = vld [vmem:[%s1915_s4 + $0x30] sm:$0xff]  ;;  %v520_v10 = vld [vmem:[%s1910_s1 + $0x8] sm:$0xff]  ;;  %v527_v13 = vld [vmem:[%s1915_s4] sm:$0xff]  ;;  %s2506_s24 = scalar_lea.vmem [#allocation6], %s1893_s25  ;;  %s2507_s27 = sld [smem:[#allocation26_spill]] }
  0x50   : > { %1443 = vset.pattern.permute.xlu2 %v1670_v2  ;;  %v525_v11 = vld [vmem:[%s1910_s1 + $0x30] sm:$0xff]  ;;  %v528_v14 = vld [vmem:[%s1915_s4 + $0x8] sm:$0xff]  ;;  %v526_v16 = vld [vmem:[%s1910_s1 + $0x38] sm:$0xff]  ;;  %s1326_s30 = sshll.u32 %s1652_s19, 1  ;;  %s1117_s19 = scalar_lea.sflag [#allocation5], %s1882_s11 }
  0x51   : > { %552 = vperm.xlu2 %1443, %v530_v7   ;;  %v529_v12 = vld [vmem:[%s1915_s4 + $0x10] sm:$0xff]  ;;  %v962_v17 = vld [vmem:[%s1920_s12] sm:$0xff]  ;;  %v522_v18 = vld [vmem:[%s1910_s1 + $0x18] sm:$0xff]  ;;  %s1127_s16 = sadd.s32 %s1656_s20, %s1326_s30  ;;  %s2511_s4 = sld [smem:[#allocation27_spill]] }
  0x52   : > { %v521_v15 = vld [vmem:[%s1910_s1 + $0x10] sm:$0xff]  ;;  %v523_v19 = vld [vmem:[%s1910_s1 + $0x20] sm:$0xff]  ;;  %s2508_s1 = sld [smem:[#allocation25_spill]]  ;;  %s1327_s26 = sshll.u32 %s1127_s16, 3 }
  0x53   : > { %v518_v6 = vld [vmem:[%s1931_s21] sm:$0xff] }
  0x54   : > { %615 = vmatpush.msra.mxu0 %v518_v6  ;;  %1332 = vmatpush.msra.mxu1 %v518_v6  ;;  %s2505_s6 = smov %s2504_s22 }
  0x55   : > { %1316 = vmatmul.msk.f32.vlgmr.msra.gmra.mxu0 %vm575_vm0, %v519_v3  ;;  %1321 = vmatmul.msk.f32.vlgmr.msra.gmra.mxu1 %vm575_vm0, %v524_v4 }
  0x57   : > { %557 = vperm.xlu1 %1442, %v531_v8   ;;  %567 = vperm.xlu0 %1441, %v533_v9  }
  0x59   : > { %547 = vperm.xlu2 %1443, %v529_v12  }
  0x5d   : > { %1317 = vmatmul.msk.f32.gmra.mxu0 %vm575_vm0, %v520_v10  ;;  %1322 = vmatmul.msk.f32.gmra.mxu1 %vm575_vm0, %v525_v11 }
  0x5f   : > { %537 = vperm.xlu1 %1442, %v527_v13   ;;  %542 = vperm.xlu0 %1441, %v528_v14  }
  0x61   : > { %965 = vperm.xlu2 %1443, %v962_v17  }
  0x65   : > { %1318 = vmatmul.msk.f32.gmra.mxu0 %vm575_vm0, %v521_v15  ;;  %1323 = vmatmul.msk.f32.gmra.mxu1 %vm575_vm0, %v526_v16 }
  0x6d   : > { %1319 = vmatmul.msk.f32.gmra.mxu0 %vm575_vm0, %v522_v18 }
  0x75   : > { %1320 = vmatmul.msk.f32.gmra.mxu0 %vm575_vm0, %v523_v19 }
  0xab   : > { %v553_v30 = vpop.permute.xlu2 %552 }
  0xb3   : > { %v548_v47 = vpop.permute.xlu2 %547 }
  0xc1   : > { %v563_v20 = vpop.permute.xlu1 %562  ;;  %v573_v21 = vpop.permute.xlu0 %572 }
  0xc9   : > { %v1955_v22 = vpop.permute.xlu1 %557  ;;  %v568_v23 = vpop.permute.xlu0 %567 }
  0xd1   : > { %v538_v28 = vpop.permute.xlu1 %537  ;;  %v543_v33 = vpop.permute.xlu0 %542 }
  0xd2   : > { %v617_v24 = vpop.f32.mrf.mxu0  ;;  %v632_v25 = vpop.f32.mrf.mxu1 }
  0xd3   : > { %v1957_v26 = vadd.f32 %v632_v25, %v563_v20  ;;  %v1962_v29 = vadd.f32 %v617_v24, %v538_v28 }
  0xd5   : > { %v1960_v27 = vmul.f32 0.70710677, %v1957_v26  ;;  %v1966_v32 = vmul.f32 0.70710677, %v1962_v29 }
  0xd7   : > { %v662_v31 = vand.u32 2147483647, %v1960_v27  ;;  %v1969_v35 = vand.u32 2147483647, %v1966_v32 }
  0xd9   : > { %v670_v34 = vmul.f32 0.3275911, %v662_v31  ;;  %v665_v41 = vmul.f32 0.3275911, %v1969_v35  ;;  %v878_v44 = vsub.f32 0.0, %v662_v31  ;;  %v873_v5 = vsub.f32 0.0, %v1969_v35 }
  0xda   : > { %v620_v36 = vpop.f32.mrf.mxu0  ;;  %v635_v37 = vpop.f32.mrf.mxu1 }
  0xdb   : > { %v1971_v38 = vadd.f32 1.0, %v670_v34  ;;  %v1973_v39 = vadd.f32 %v620_v36, %v543_v33  ;;  %v636_v40 = vadd.f32 %v635_v37, %v568_v23  ;;  %v1977_v42 = vadd.f32 1.0, %v665_v41 }
  0xdc   : > { %v886_v53 = vmul.f32 %v878_v44, %v662_v31 }
  0xdd   : > { %1446 = vrcp.f32 %v1971_v38  ;;  %v1980_v43 = vmul.f32 0.70710677, %v1973_v39  ;;  %v1982_v45 = vmul.f32 0.70710677, %v636_v40  ;;  %v767_v4 = vand.u32 2147483648, %v1971_v38 }
  0xde   : > { %1448 = vrcp.f32 %v1977_v42  ;;  %v899_v0 = vmul.f32 1.442695, %v886_v53  ;;  %vm761_vm1 = vweird.f32 %v1971_v38  ;;  %v765_v11 = vand.u32 2147483647, %v1971_v38 }
  0xdf   : > { %v658_v46 = vand.u32 2147483647, %v1980_v43  ;;  %v663_v48 = vand.u32 2147483647, %v1982_v45  ;;  %v2013_v12 = vmul.f32 0.5, %v636_v40  ;;  %v768_v19 = vor.u32 1.1754944e-38, %v767_v4 }
  0xe0   : > { %vm2028_vm3 = vcmp.eq.f32.partialorder %v765_v11, 8.507059e+37 }
  0xe1   : > { %v666_v49 = vmul.f32 0.3275911, %v658_v46  ;;  %v671_v54 = vmul.f32 0.3275911, %v663_v48  ;;  %v879_v58 = vsub.f32 0.0, %v663_v48  ;;  %v874_v59 = vsub.f32 0.0, %v658_v46 }
  0xe2   : > { %v623_v50 = vpop.f32.mrf.mxu0  ;;  %v638_v51 = vpop.f32.mrf.mxu1 }
  0xe3   : > { %v1987_v52 = vpop.eup %1446  ;;  %v1989_v55 = vadd.f32 %v623_v50, %v548_v47  ;;  %v1993_v57 = vadd.f32 1.0, %v666_v49  ;;  %v1995_v60 = vadd.f32 1.0, %v671_v54  ;;  %v639_v62 = vadd.f32 %v638_v51, %v573_v21 }
  0xe4   : > { %v757_v56 = vmul.f32 %v1987_v52, %v1971_v38  ;;  %v2001_v63 = vpop.eup %1448  ;;  %v887_v2 = vmul.f32 %v879_v58, %v663_v48  ;;  %v882_v6 = vmul.f32 %v874_v59, %v658_v46  ;;  %vm762_vm2 = vweird.f32 %v1987_v52 }
  0xe5   : > { %v1998_v61 = vmul.f32 0.70710677, %v1989_v55  ;;  %1450 = vrcp.f32 %v1993_v57  ;;  %v2007_v7 = vmul.f32 0.70710677, %v639_v62  ;;  %v682_v8 = vmul.f32 %v2001_v63, %v1977_v42  ;;  %vm2063_vm7 = vmor %vm761_vm1, %vm762_vm2 }
  0xe6   : > { %1452 = vrcp.f32 %v1995_v60  ;;  %v758_v1 = vsub.f32 1.0, %v757_v56  ;;  %v901_v17 = vmul.f32 1.442695, %v887_v2  ;;  %v2023_v21 = vmul.f32 1.442695, %v882_v6 }
  0xe7   : > { %v659_v3 = vand.u32 2147483647, %v1998_v61  ;;  %1454 = vpow2.f32 %v899_v0  ;;  %v664_v13 = vand.u32 2147483647, %v2007_v7  ;;  %v683_v25 = vsub.f32 1.0, %v682_v8 }
  0xe8   : > { %v759_v16 = vmul.f32 %v1987_v52, %v758_v1  ;;  %v780_v36 = vand.u32 2147483647, %v1995_v60  ;;  %v782_v37 = vand.u32 2147483648, %v1995_v60  ;;  %vm776_vm4 = vweird.f32 %v1995_v60 }
  0xe9   : > { %v667_v9 = vmul.f32 0.3275911, %v659_v3  ;;  %v672_v23 = vmul.f32 0.3275911, %v664_v13  ;;  %v880_v24 = vsub.f32 0.0, %v664_v13  ;;  %v2045_v47 = vmul.f32 0.5, %v639_v62 }
  0xea   : > { %v626_v10 = vpop.f32.mrf.mxu0  ;;  %v760_v44 = vadd.f32 %v1987_v52, %v759_v16  ;;  %v2049_v49 = vmul.f32 %v2001_v63, %v683_v25  ;;  %vm2055_vm6 = vcmp.eq.f32.partialorder %v780_v36, 8.507059e+37  ;;  %v783_v59 = vor.u32 1.1754944e-38, %v782_v37 }
  0xeb   : > { %v2016_v14 = vadd.f32 %v626_v10, %v553_v30  ;;  %v2018_v15 = vpop.eup %1450  ;;  %v2021_v18 = vadd.f32 1.0, %v667_v9  ;;  %v875_v30 = vsub.f32 0.0, %v659_v3  ;;  %v2032_v33 = vadd.f32 1.0, %v672_v23 }
  0xec   : > { %v1453_v20 = vpop.eup %1452  ;;  %v697_v40 = vmul.f32 %v2018_v15, %v1993_v57  ;;  %v888_v48 = vmul.f32 %v880_v24, %v664_v13  ;;  %vm701_vm15 = vweird.f32 %v1993_v57 }
  0xed   : > { %v772_v28 = vmul.f32 %v1453_v20, %v1995_v60  ;;  %1456 = vrcp.f32 %v2021_v18  ;;  %v2035_v34 = vmul.f32 0.70710677, %v2016_v14  ;;  %v2042_v46 = vpop.eup %1454  ;;  %vm777_vm5 = vweird.f32 %v1453_v20 }
  0xee   : > { %1458 = vpow2.f32 %v901_v17  ;;  %v883_v54 = vmul.f32 %v875_v30, %v659_v3  ;;  %v698_v1 = vsub.f32 1.0, %v697_v40  ;;  %v903_v6 = vmul.f32 1.442695, %v888_v48  ;;  %vm778_vm8 = vmor %vm776_vm4, %vm777_vm5 }
  0xef   : > { %v773_v41 = vsub.f32 1.0, %v772_v28  ;;  %1460 = vrcp.f32 %v2032_v33  ;;  %v660_v51 = vand.u32 2147483647, %v2035_v34  ;;  %v795_v11 = vand.u32 2147483647, %v2032_v33 }
  0xf0   : > { %v2096_v25 = vmul.f32 %v2018_v15, %v698_v1  ;;  %v2098_v28 = vmul.f32 1.442695, %v883_v54  ;;  %vm791_vm9 = vweird.f32 %v2032_v33  ;;  %vm716_vm10 = vweird.f32 %v2021_v18 }
  0xf1   : > { %v774_v50 = vmul.f32 %v1453_v20, %v773_v41  ;;  %v668_v2 = vmul.f32 0.3275911, %v660_v51  ;;  %v876_v8 = vsub.f32 0.0, %v660_v51  ;;  %vm2109_vm11 = vcmp.eq.f32.partialorder %v795_v11, 8.507059e+37 }
  0xf2   : > { %v629_v53 = vpop.f32.mrf.mxu0  ;;  %v720_v48 = vand.u32 2147483647, %v2021_v18 }
  0xf3   : > { %v2053_v56 = vadd.f32 %v629_v53, %v1955_v22  ;;  %v2067_v0 = vpop.eup %1456  ;;  %v775_v3 = vadd.f32 %v1453_v20, %v774_v50  ;;  %v764_v22 = vsel %vm2063_vm7, %v1987_v52, %v760_v44  ;;  %v2082_v10 = vadd.f32 1.0, %v668_v2 }
  0xf4   : > { %v712_v4 = vmul.f32 %v2067_v0, %v2021_v18  ;;  %v2080_v9 = vpop.eup %1458  ;;  %v797_v52 = vand.u32 2147483648, %v2032_v33  ;;  %v2093_v60 = vsel %vm2028_vm3, %v768_v19, %v764_v22  ;;  %vm717_vm3 = vweird.f32 %v2067_v0 }
  0xf5   : > { %v2075_v38 = vmul.f32 0.70710677, %v2053_v56  ;;  %v779_v13 = vsel %vm778_vm8, %v1453_v20, %v775_v3  ;;  %v1461_v16 = vpop.eup %1460  ;;  %1462 = vrcp.f32 %v2082_v10  ;;  %v884_v20 = vmul.f32 %v876_v8, %v660_v51  ;;  %vm2154_vm5 = vmor %vm716_vm10, %vm717_vm3 }
  0xf6   : > { %v713_v17 = vsub.f32 1.0, %v712_v4  ;;  %v2089_v24 = vsel %vm2055_vm6, %v783_v59, %v779_v13  ;;  %v787_v30 = vmul.f32 %v1461_v16, %v2032_v33  ;;  %1464 = vpow2.f32 %v903_v6 }
  0xf7   : > { %v661_v23 = vand.u32 2147483647, %v2075_v38  ;;  %v807_v31 = vmul.f32 1.0614054, %v2089_v24  ;;  %v806_v19 = vmul.f32 1.0614054, %v2093_v60  ;;  %vm792_vm12 = vweird.f32 %v1461_v16 }
  0xf8   : > { %v788_v37 = vsub.f32 1.0, %v787_v30  ;;  %v714_v41 = vmul.f32 %v2067_v0, %v713_v17  ;;  %v798_v50 = vor.u32 1.1754944e-38, %v797_v52  ;;  %vm731_vm13 = vweird.f32 %v2082_v10  ;;  %vm793_vm14 = vmor %vm791_vm9, %vm792_vm12 }
  0xf9   : > { %v669_v36 = vmul.f32 0.3275911, %v661_v23  ;;  %v877_v40 = vsub.f32 0.0, %v661_v23  ;;  %v815_v51 = vadd.f32 -1.4531521, %v807_v31  ;;  %v737_v11 = vand.u32 2147483648, %v2082_v10 }
  0xfa   : > { %v789_v53 = vmul.f32 %v1461_v16, %v788_v37  ;;  %v814_v54 = vadd.f32 -1.4531521, %v806_v19  ;;  %v2114_v58 = vmul.f32 1.442695, %v884_v20  ;;  %v735_v59 = vand.u32 2147483647, %v2082_v10 }
  0xfb   : > { %v2107_v44 = vadd.f32 1.0, %v669_v36  ;;  %v1463_v62 = vpop.eup %1462  ;;  %v2118_v1 = vmul.f32 %v877_v40, %v661_v23  ;;  %v823_v3 = vmul.f32 %v815_v51, %v2089_v24  ;;  %v715_v52 = vadd.f32 %v2067_v0, %v714_v41 }
  0xfc   : > { %v790_v2 = vadd.f32 %v1461_v16, %v789_v53  ;;  %v822_v22 = vmul.f32 %v814_v54, %v2093_v60  ;;  %v2122_v4 = vpop.eup %1464  ;;  %v727_v6 = vmul.f32 %v1463_v62, %v2082_v10  ;;  %vm732_vm0 = vweird.f32 %v1463_v62 }
  0xfd   : > { %1466 = vrcp.f32 %v2107_v44  ;;  %v750_v8 = vand.u32 2147483647, %v2107_v44  ;;  %v831_v17 = vadd.f32 1.4214138, %v823_v3  ;;  %v752_v30 = vand.u32 2147483648, %v2107_v44  ;;  %vm733_vm7 = vmor %vm731_vm13, %vm732_vm0 }
  0xfe   : > { %v794_v13 = vsel %vm793_vm14, %v1461_v16, %v790_v2  ;;  %v830_v23 = vadd.f32 1.4214138, %v822_v22  ;;  %v728_v20 = vsub.f32 1.0, %v727_v6  ;;  %vm2136_vm1 = vcmp.eq.f32.partialorder %v735_v59, 8.507059e+37 }
  0xff   : > { %v2134_v36 = vsel %vm2109_vm11, %v798_v50, %v794_v13  ;;  %vm746_vm2 = vweird.f32 %v2107_v44  ;;  %v839_v37 = vmul.f32 %v831_v17, %v2089_v24  ;;  %v738_v41 = vor.u32 1.1754944e-38, %v737_v11 }
 0x100   : > { %v808_v16 = vmul.f32 1.0614054, %v2134_v36  ;;  %v838_v40 = vmul.f32 %v830_v23, %v2093_v60  ;;  %v729_v19 = vmul.f32 %v1463_v62, %v728_v20  ;;  %v722_v50 = vand.u32 2147483648, %v2021_v18 }
 0x101   : > { %v847_v54 = vadd.f32 -0.28449672, %v839_v37  ;;  %vm2148_vm4 = vcmp.eq.f32.partialorder %v750_v8, 8.507059e+37  ;;  %v719_v6 = vsel %vm2154_vm5, %v2067_v0, %v715_v52  ;;  %v700_v11 = vadd.f32 %v2018_v15, %v2096_v25 }
 0x102   : > { %v816_v51 = vadd.f32 -1.4531521, %v808_v16  ;;  %v846_v59 = vadd.f32 -0.28449672, %v838_v40  ;;  %v730_v22 = vadd.f32 %v1463_v62, %v729_v19  ;;  %vm721_vm8 = vcmp.eq.f32.partialorder %v720_v48, 8.507059e+37 }
 0x103   : > { %v1467_v31 = vpop.eup %1466  ;;  %v855_v17 = vmul.f32 %v847_v54, %v2089_v24  ;;  %v723_v20 = vor.u32 1.1754944e-38, %v722_v50  ;;  %vm702_vm9 = vweird.f32 %v2018_v15  ;;  %v753_v37 = vor.u32 1.1754944e-38, %v752_v30 }
 0x104   : > { %v742_v53 = vmul.f32 %v1467_v31, %v2107_v44  ;;  %vm747_vm6 = vweird.f32 %v1467_v31  ;;  %v824_v8 = vmul.f32 %v816_v51, %v2134_v36  ;;  %v854_v18 = vmul.f32 %v846_v59, %v2093_v60  ;;  %vm2182_vm10 = vmor %vm701_vm15, %vm702_vm9 }
 0x105   : > { %v734_v23 = vsel %vm733_vm7, %v1463_v62, %v730_v22  ;;  %v863_v16 = vadd.f32 0.2548296, %v855_v17  ;;  %v2174_v19 = vsel %vm721_vm8, %v723_v20, %v719_v6  ;;  %vm748_vm11 = vmor %vm746_vm2, %vm747_vm6  ;;  %vm927_vm12 = vcmp.lt.f32.partialorder %v1982_v45, 0.0 }
 0x106   : > { %v743_v13 = vsub.f32 1.0, %v742_v53  ;;  %v832_v52 = vadd.f32 1.4214138, %v824_v8  ;;  %v862_v25 = vadd.f32 0.2548296, %v854_v18  ;;  %v2172_v40 = vsel %vm2136_vm1, %v738_v41, %v734_v23 }
 0x107   : > { %v705_v53 = vand.u32 2147483647, %v1993_v57  ;;  %v871_v62 = vmul.f32 %v863_v16, %v2089_v24  ;;  %v804_v30 = vmul.f32 1.0614054, %v2172_v40  ;;  %v803_v33 = vmul.f32 1.0614054, %v2174_v19 }
 0x108   : > { %v744_v0 = vmul.f32 %v1467_v31, %v743_v13  ;;  %v840_v10 = vmul.f32 %v832_v52, %v2134_v36  ;;  %v870_v48 = vmul.f32 %v862_v25, %v2093_v60  ;;  %v704_v24 = vsel %vm2182_vm10, %v2018_v15, %v700_v11 }
 0x109   : > { %v707_v60 = vand.u32 2147483648, %v1993_v57  ;;  %v911_v54 = vmul.f32 %v2080_v9, %v871_v62  ;;  %vm686_vm13 = vweird.f32 %v1977_v42  ;;  %v812_v22 = vadd.f32 -1.4531521, %v804_v30 }
 0x10a   : > { %v745_v50 = vadd.f32 %v1467_v31, %v744_v0  ;;  %v848_v41 = vadd.f32 -0.28449672, %v840_v10  ;;  %v910_v59 = vmul.f32 %v2042_v46, %v870_v48  ;;  %v811_v6 = vadd.f32 -1.4531521, %v803_v33 }
 0x10b   : > { %v708_v13 = vor.u32 1.1754944e-38, %v707_v60  ;;  %v919_v57 = vsub.f32 1.0, %v911_v54  ;;  %vm706_vm14 = vcmp.eq.f32.partialorder %v705_v53, 8.507059e+37  ;;  %vm926_vm15 = vcmp.lt.f32.partialorder %v1960_v27, 0.0 }
 0x10c   : > { %v749_v3 = vsel %vm748_vm11, %v1467_v31, %v745_v50  ;;  %v856_v15 = vmul.f32 %v848_v41, %v2134_v36  ;;  %v897_v46 = vmul.f32 1.442695, %v2118_v1  ;;  %v820_v9 = vmul.f32 %v812_v22, %v2172_v40 }
 0x10d   : > { %v2201_v44 = vsel %vm2148_vm4, %v753_v37, %v749_v3  ;;  %v819_v31 = vmul.f32 %v811_v6, %v2174_v19  ;;  %v2209_v2 = vsel %vm706_vm14, %v708_v13, %v704_v24  ;;  %v935_v17 = vsub.f32 0.0, %v919_v57 }
 0x10e   : > { %v805_v11 = vmul.f32 1.0614054, %v2201_v44  ;;  %v864_v8 = vadd.f32 0.2548296, %v856_v15  ;;  %v918_v18 = vsub.f32 1.0, %v910_v59  ;;  %1468 = vpow2.f32 %v2098_v28 }
 0x10f   : > { %v828_v20 = vadd.f32 1.4214138, %v820_v9  ;;  %v827_v0 = vadd.f32 1.4214138, %v819_v31  ;;  %v802_v52 = vmul.f32 1.0614054, %v2209_v2  ;;  %1470 = vpow2.f32 %v2114_v58 }
 0x110   : > { %v813_v23 = vadd.f32 -1.4531521, %v805_v11  ;;  %vm928_vm0 = vcmp.lt.f32.partialorder %v2007_v7, 0.0  ;;  %v872_v1 = vmul.f32 %v864_v8, %v2134_v36  ;;  %v685_v53 = vadd.f32 %v2001_v63, %v2049_v49  ;;  %v1008_v7 = vld [vmem:[%s2505_s6 + $0x70] sm:$0xff] }
 0x111   : > { %v836_v25 = vmul.f32 %v828_v20, %v2172_v40  ;;  %v835_v37 = vmul.f32 %v827_v0, %v2174_v19  ;;  %vm687_vm1 = vweird.f32 %v2001_v63  ;;  %v934_v10 = vsub.f32 0.0, %v918_v18 }
 0x112   : > { %v821_v16 = vmul.f32 %v813_v23, %v2201_v44  ;;  %v912_v28 = vmul.f32 %v2122_v4, %v872_v1  ;;  %v810_v48 = vadd.f32 -1.4531521, %v802_v52  ;;  %1472 = vpow2.f32 %v897_v46  ;;  %vm2229_vm2 = vmor %vm686_vm13, %vm687_vm1  ;;  %v1009_v23 = vld [vmem:[%s2504_s22 + $0x78] sm:$0xff]  ;;  %s1131_s22 = sshll.u32 %s1922_s17, 4  ;;  %s1132_s22 = int_to_ptr.vmem [resolvable:$true] %s1131_s22 }
 0x113   : > { %v943_v58 = vsel %vm927_vm12, %v935_v17, %v919_v57  ;;  %v844_v36 = vadd.f32 -0.28449672, %v836_v25  ;;  %v843_v50 = vadd.f32 -0.28449672, %v835_v37  ;;  %v690_v4 = vand.u32 2147483647, %v1977_v42  ;;  %1014 = vmatpush.msra.mxu2 %v1009_v23 }
 0x114   : > { %v829_v62 = vadd.f32 1.4214138, %v821_v16  ;;  %v920_v51 = vsub.f32 1.0, %v912_v28  ;;  %v818_v33 = vmul.f32 %v810_v48, %v2209_v2  ;;  %v1469_v24 = vpop.eup %1468  ;;  %v689_v41 = vsel %vm2229_vm2, %v2001_v63, %v685_v53  ;;  %v1007_v25 = vld [vmem:[%s2505_s6 + $0x68] sm:$0xff]  ;;  %v1006_v48 = vld [vmem:[%s2505_s6 + $0x60] sm:$0xff] }
 0x115   : > { %v852_v60 = vmul.f32 %v844_v36, %v2172_v40  ;;  %v851_v45 = vmul.f32 %v843_v50, %v2174_v19  ;;  %v692_v54 = vand.u32 2147483648, %v1977_v42  ;;  %v1471_v59 = vpop.eup %1470  ;;  %v942_v22 = vsel %vm926_vm15, %v934_v10, %v918_v18  ;;  %1015 = vmatpush.msra.mxu2 %v1008_v7  ;;  %v999_v7 = vld [vmem:[%s2505_s6 + $0x28] sm:$0xff] }
 0x116   : > { %v837_v30 = vmul.f32 %v829_v62, %v2201_v44  ;;  %v936_v3 = vsub.f32 0.0, %v920_v51  ;;  %v826_v13 = vadd.f32 1.4214138, %v818_v33  ;;  %v951_v15 = vadd.f32 1.0, %v943_v58 }
 0x117   : > { %v860_v57 = vadd.f32 0.2548296, %v852_v60  ;;  %v859_v11 = vadd.f32 0.2548296, %v851_v45  ;;  %v693_v46 = vor.u32 1.1754944e-38, %v692_v54  ;;  %vm691_vm3 = vcmp.eq.f32.partialorder %v690_v4, 8.507059e+37  ;;  %1016 = vmatpush.msra.mxu2 %v1007_v25 }
 0x118   : > { %v845_v6 = vadd.f32 -0.28449672, %v837_v30  ;;  %v944_v9 = vsel %vm928_vm0, %v936_v3, %v920_v51  ;;  %v834_v63 = vmul.f32 %v826_v13, %v2209_v2  ;;  %v1473_v42 = vpop.eup %1472  ;;  %1474 = vpow2.f32 %v2023_v21 }
 0x119   : > { %v952_v8 = vadd.f32 1.0, %v944_v9  ;;  %v868_v17 = vmul.f32 %v860_v57, %v2172_v40  ;;  %v867_v27 = vmul.f32 %v859_v11, %v2174_v19  ;;  %v2248_v18 = vsel %vm691_vm3, %v693_v46, %v689_v41  ;;  %1017 = vmatpush.msra.mxu2 %v1006_v48  ;;  %v1089_v48 = vld [vmem:[%s2507_s27 + $0x78] sm:$0xff] }
 0x11a   : > { %v853_v31 = vmul.f32 %v845_v6, %v2201_v44  ;;  %v842_v0 = vadd.f32 -0.28449672, %v834_v63  ;;  %v801_v52 = vmul.f32 1.0614054, %v2248_v18  ;;  %v950_v19 = vadd.f32 1.0, %v942_v22  ;;  %1094 = vmatpush.msra.mxu3 %v1089_v48 }
 0x11b   : > { %v960_v40 = vmul.f32 %v952_v8, %v2045_v47  ;;  %v908_v1 = vmul.f32 %v1471_v59, %v868_v17  ;;  %v907_v16 = vmul.f32 %v1469_v24, %v867_v27  ;;  %v646_v21 = vmul.f32 0.5, %v1957_v26 }
 0x11c   : > { %v861_v20 = vadd.f32 0.2548296, %v853_v31  ;;  %v850_v53 = vmul.f32 %v842_v0, %v2209_v2  ;;  %v809_v28 = vadd.f32 -1.4531521, %v801_v52  ;;  %v959_v10 = vmul.f32 %v951_v15, %v2013_v12  ;;  %v1005_v12 = vld [vmem:[%s2505_s6 + $0x58] sm:$0xff]  ;;  %v998_v52 = vld [vmem:[%s2505_s6 + $0x20] sm:$0xff] }
 0x11d   : > { %980 = vmatpush.msrb.mxu1 %v960_v40  ;;  %v916_v62 = vsub.f32 1.0, %v908_v1  ;;  %v915_v47 = vsub.f32 1.0, %v907_v16  ;;  %v881_v58 = vmul.f32 %v873_v5, %v1969_v35  ;;  %v958_v26 = vmul.f32 %v950_v19, %v646_v21  ;;  %v1004_v35 = vld [vmem:[%s2505_s6 + $0x50] sm:$0xff]  ;;  %1018 = vmatpush.msra.mxu2 %v1005_v12 }
 0x11e   : > { %v869_v37 = vmul.f32 %v861_v20, %v2201_v44  ;;  %v858_v36 = vadd.f32 0.2548296, %v850_v53  ;;  %v817_v50 = vmul.f32 %v809_v28, %v2248_v18  ;;  %v1475_v30 = vpop.eup %1474  ;;  %vm924_vm4 = vcmp.lt.f32.partialorder %v2035_v34, 0.0  ;;  %v1003_v34 = vld [vmem:[%s2505_s6 + $0x48] sm:$0xff]  ;;  %v996_v53 = vld [vmem:[%s2505_s6 + $0x10] sm:$0xff]  ;;  %v966_v28 = vpop.permute.xlu2 %965 }
 0x11f   : > { %981 = vmatpush.msrb.mxu1 %v959_v10  ;;  %v932_v51 = vsub.f32 0.0, %v916_v62  ;;  %v931_v49 = vsub.f32 0.0, %v915_v47  ;;  %v889_v5 = vmul.f32 1.442695, %v881_v58  ;;  %vm923_vm5 = vcmp.lt.f32.partialorder %v1998_v61, 0.0  ;;  %1019 = vmatpush.msra.mxu2 %v1004_v35  ;;  %v1002_v61 = vld [vmem:[%s2505_s6 + $0x40] sm:$0xff] }
 0x120   : > { %v909_v44 = vmul.f32 %v1473_v42, %v869_v37  ;;  %v866_v4 = vmul.f32 %v858_v36, %v2209_v2  ;;  %v825_v24 = vadd.f32 1.4214138, %v817_v50  ;;  %vm925_vm6 = vcmp.lt.f32.partialorder %v2075_v38, 0.0  ;;  %v961_v37 = vld [vmem:[%s2506_s24] sm:$0xff]  ;;  %v992_v10 = vld [vmem:[%s1886_s8] sm:$0xff]  ;;  %s2509_s8 = sld [smem:[#allocation28_spill]] }
 0x121   : > { %982 = vmatpush.msrb.mxu1 %v958_v26  ;;  %v940_v45 = vsel %vm924_vm4, %v932_v51, %v916_v62  ;;  %v939_v59 = vsel %vm923_vm5, %v931_v49, %v915_v47  ;;  %v645_v22 = vmul.f32 0.5, %v2053_v56  ;;  %1476 = vpow2.f32 %v889_v5  ;;  %1020 = vmatpush.msra.mxu2 %v1003_v34  ;;  %v1001_v56 = vld [vmem:[%s2505_s6 + $0x38] sm:$0xff]  ;;  %v1088_v58 = vld [vmem:[%s2507_s27 + $0x70] sm:$0xff]  ;;  %v1086_v36 = vld [vmem:[%s2507_s27 + $0x60] sm:$0xff] }
 0x122   : > { %v917_v33 = vsub.f32 1.0, %v909_v44  ;;  %v906_v41 = vmul.f32 %v1475_v30, %v866_v4  ;;  %v833_v2 = vmul.f32 %v825_v24, %v2248_v18  ;;  %v948_v13 = vadd.f32 1.0, %v940_v45  ;;  %v1087_v44 = vld [vmem:[%s2507_s27 + $0x68] sm:$0xff]  ;;  %1095 = vmatpush.msra.mxu3 %v1088_v58  ;;  %v1085_v50 = vld [vmem:[%s2507_s27 + $0x58] sm:$0xff]  ;;  %v1444_v26 = vld [vmem:[%s2508_s1] ss:$0 sm:$0xff] }
 0x123   : > { %vm922_vm7 = vcmp.lt.f32.partialorder %v1980_v43, 0.0  ;;  %v644_v57 = vmul.f32 0.5, %v2016_v14  ;;  %v947_v46 = vadd.f32 1.0, %v939_v59  ;;  %1021 = vmatpush.msra.mxu2 %v1002_v61  ;;  %v643_v63 = vmul.f32 0.5, %v1989_v55  ;;  %v1000_v14 = vld [vmem:[%s2505_s6 + $0x30] sm:$0xff]  ;;  %v1083_v30 = vld [vmem:[%s2507_s27 + $0x48] sm:$0xff] }
 0x124   : > { %v933_v60 = vsub.f32 0.0, %v917_v33  ;;  %v914_v3 = vsub.f32 1.0, %v906_v41  ;;  %v841_v15 = vadd.f32 -0.28449672, %v833_v2  ;;  %v642_v17 = vmul.f32 0.5, %v1973_v39  ;;  %1096 = vmatpush.msra.mxu3 %v1087_v44  ;;  %v1084_v51 = vld [vmem:[%s2507_s27 + $0x50] sm:$0xff] }
 0x125   : > { %v956_v42 = vmul.f32 %v948_v13, %v644_v57  ;;  %1022 = vmatpush.msra.mxu2 %v1001_v56  ;;  %v955_v27 = vmul.f32 %v947_v46, %v643_v63  ;;  %vm921_vm8 = vcmp.lt.f32.partialorder %v1966_v32, 0.0  ;;  %v641_v1 = vmul.f32 0.5, %v1962_v29  ;;  %v995_v32 = vld [vmem:[%s2505_s6 + $0x8] sm:$0xff]  ;;  %v994_v29 = vld [vmem:[%s2505_s6] sm:$0xff]  ;;  %v1081_v24 = vld [vmem:[%s2507_s27 + $0x38] sm:$0xff] }
 0x126   : > { %v941_v54 = vsel %vm925_vm6, %v933_v60, %v917_v33  ;;  %v930_v38 = vsub.f32 0.0, %v914_v3  ;;  %v849_v9 = vmul.f32 %v841_v15, %v2248_v18  ;;  %vm968_vm9 = vcmask 523264   ;;  %1097 = vmatpush.msra.mxu3 %v1086_v36  ;;  %v1082_v49 = vld [vmem:[%s2507_s27 + $0x40] sm:$0xff]  ;;  %v1080_v5 = vld [vmem:[%s2507_s27 + $0x30] sm:$0xff]  ;;  %v1079_v45 = vld [vmem:[%s2507_s27 + $0x28] sm:$0xff]  ;;  %s1129_s28 = scalar_lea.hbm %s2509_s8, %s1327_s26  ;;  %s1562_s30 = scalar_lea.hbm %s2509_s8, 32 }
 0x127   : > { %v949_v6 = vadd.f32 1.0, %v941_v54  ;;  %v1477_v55 = vpop.eup %1476  ;;  %1023 = vmatpush.msra.mxu2 %v1000_v14  ;;  %v1078_v2 = vld [vmem:[%s2507_s27 + $0x20] sm:$0xff]  ;;  %v1077_v34 = vld [vmem:[%s2507_s27 + $0x18] sm:$0xff]  ;;  %v1076_v54 = vld [vmem:[%s2507_s27 + $0x10] sm:$0xff]  ;;  %s1133_s9 = sshll.u32 %s1129_s28, 4  ;;  %s1134_s9 = int_to_ptr.hbm [resolvable:$true] %s1133_s9 }
 0x128   : > { %v938_v31 = vsel %vm922_vm7, %v930_v38, %v914_v3  ;;  %v857_v43 = vadd.f32 0.2548296, %v849_v9  ;;  %1098 = vmatpush.msra.mxu3 %v1085_v50  ;;  %v1075_v59 = vld [vmem:[%s2507_s27 + $0x8] sm:$0xff]  ;;  %s1556_s20 = sshra.s32 %s1134_s9, 4  ;;  %s1557_s20 = int_to_ptr.hbm [resolvable:$true] %s1556_s20 }
 0x129   : > { %v957_v11 = vmul.f32 %v949_v6, %v645_v22  ;;  %v946_v8 = vadd.f32 1.0, %v938_v31  ;;  %1024 = vmatpush.msra.mxu2 %v999_v7  ;;  %v1074_v6 = vld [vmem:[%s2507_s27] sm:$0xff]  ;;  %s1558_s25 = scalar_lea.hbm %s1557_s20, 8  ;;  %p1563_p9 = scmp.lt.s32.totalorder %s1557_s20, %s2509_s8 }
 0x12a   : > { %v865_v23 = vmul.f32 %v857_v43, %v2248_v18  ;;  %v997_v18 = vld [vmem:[%s2505_s6 + $0x18] sm:$0xff]  ;;  %1099 = vmatpush.msra.mxu3 %v1084_v51  ;;  %p1559_p0 = scmp.ne.s32.totalorder %s1557_s20, %s1558_s25  ;;  %p1564_p10 = scmp.lt.s32.totalorder %s1562_s30, %s1558_s25 }
 0x12b   : > { %983 = vmatpush.msrb.mxu1 %v957_v11  ;;  %v954_v20 = vmul.f32 %v946_v8, %v642_v17  ;;  %1025 = vmatpush.msra.mxu2 %v998_v52 }
 0x12c   : > { %v905_v0 = vmul.f32 %v1477_v55, %v865_v23  ;;  %1100 = vmatpush.msra.mxu3 %v1083_v30  ;;  %p1560_p4 = pnand %p1559_p0, %p1826_p11  ;;  %p1565_p12 = por %p1564_p10, %p1563_p9 }
 0x12d   : > { %984 = vmatpush.msrb.mxu1 %v956_v42  ;;  %1026 = vmatpush.msra.mxu2 %v997_v18 }
 0x12e   : > { %v913_v39 = vsub.f32 1.0, %v905_v0  ;;  %1101 = vmatpush.msra.mxu3 %v1082_v49  ;;  %p1561_p5 = pneg %p1560_p4 }
 0x12f   : > { %985 = vmatpush.msrb.mxu1 %v955_v27  ;;  %1027 = vmatpush.msra.mxu2 %v996_v53 }
 0x130   : > { %v929_v40 = vsub.f32 0.0, %v913_v39  ;;  %1102 = vmatpush.msra.mxu3 %v1081_v24  ;;  %p1566_p3 = pnand %p1565_p12, %p1561_p5 }
 0x131   : > { %986 = vmatpush.msrb.mxu1 %v954_v20  ;;  %1028 = vmatpush.msra.mxu2 %v995_v32 }
 0x132   : > { %v937_v19 = vsel %vm921_vm8, %v929_v40, %v913_v39  ;;  %1103 = vmatpush.msra.mxu3 %v1080_v5 }
 0x133   : > { %v945_v16 = vadd.f32 1.0, %v937_v19  ;;  %1029 = vmatpush.msra.mxu2 %v994_v29 }
 0x134   : > { %1104 = vmatpush.msra.mxu3 %v1079_v45 }
 0x135   : > { %v953_v25 = vmul.f32 %v945_v16, %v641_v1  ;;  %v1445_v16 = vld [vmem:[%s2511_s4] ss:$0 sm:$0xff] }
 0x136   : > { %1105 = vmatpush.msra.mxu3 %v1078_v2 }
 0x137   : > { %987 = vmatpush.msrb.mxu1 %v953_v25 }
 0x138   : > { %1324 = vmatmul.msk.f32.vlgmr.msrb.gmra.mxu1 %vm968_vm9, %v961_v37  ;;  %1106 = vmatpush.msra.mxu3 %v1077_v34 }
 0x13a   : > { %1107 = vmatpush.msra.mxu3 %v1076_v54 }
 0x13c   : > { %1108 = vmatpush.msra.mxu3 %v1075_v59 }
 0x13e   : > { %1109 = vmatpush.msra.mxu3 %v1074_v6 }
 0x1b5   : > { %v989_v21 = vpop.f32.mrf.mxu1 }
 0x1b6   : > { %v990_v62 = vadd.f32 %v989_v21, %v966_v28 }
 0x1b8   : > { %v993_v47 = vadd.f32 %v992_v10, %v990_v62 }
 0x1ba   : > { %1030 = vmatmul.f32.vlgmr.msra.gmra.mxu2 %v993_v47 }
 0x23d   : > { %v1031_v12 = vpop.f32.mrf.mxu2 }
 0x23e   : > { %v1032_v33 = vadd.f32 %v1444_v26, %v1031_v12 }
 0x240   : > { %v1035_v4 = vmul.f32 0.70710677, %v1032_v33  ;;  %v1034_v40 = vmul.f32 0.5, %v1032_v33 }
 0x242   : > { %v1036_v35 = vand.u32 2147483647, %v1035_v4  ;;  %vm1069_vm14 = vcmp.lt.f32.partialorder %v1035_v4, 0.0 }
 0x244   : > { %v1037_v60 = vmul.f32 0.3275911, %v1036_v35  ;;  %v1063_v9 = vsub.f32 0.0, %v1036_v35 }
 0x246   : > { %v1038_v41 = vadd.f32 1.0, %v1037_v60  ;;  %v1064_v42 = vmul.f32 %v1063_v9, %v1036_v35 }
 0x248   : > { %1478 = vrcp.f32 %v1038_v41  ;;  %v1050_v15 = vand.u32 2147483648, %v1038_v41  ;;  %v1048_v38 = vand.u32 2147483647, %v1038_v41  ;;  %vm1044_vm11 = vweird.f32 %v1038_v41 }
 0x249   : > { %v1065_v14 = vmul.f32 1.442695, %v1064_v42 }
 0x24a   : > { %v1051_v11 = vor.u32 1.1754944e-38, %v1050_v15  ;;  %vm1049_vm13 = vcmp.eq.f32.partialorder %v1048_v38, 8.507059e+37 }
 0x24b   : > { %1480 = vpow2.f32 %v1065_v14 }
 0x24e   : > { %v1479_v3 = vpop.eup %1478 }
 0x24f   : > { %v1040_v22 = vmul.f32 %v1479_v3, %v1038_v41  ;;  %vm1045_vm10 = vweird.f32 %v1479_v3 }
 0x250   : > { %vm1046_vm12 = vmor %vm1044_vm11, %vm1045_vm10 }
 0x251   : > { %v1041_v13 = vsub.f32 1.0, %v1040_v22  ;;  %v1481_v20 = vpop.eup %1480 }
 0x253   : > { %v1042_v61 = vmul.f32 %v1479_v3, %v1041_v13 }
 0x255   : > { %v1043_v57 = vadd.f32 %v1479_v3, %v1042_v61 }
 0x257   : > { %v1047_v46 = vsel %vm1046_vm12, %v1479_v3, %v1043_v57 }
 0x258   : > { %v1052_v56 = vsel %vm1049_vm13, %v1051_v11, %v1047_v46 }
 0x259   : > { %v1054_v31 = vmul.f32 1.0614054, %v1052_v56 }
 0x25b   : > { %v1055_v63 = vadd.f32 -1.4531521, %v1054_v31 }
 0x25d   : > { %v1056_v8 = vmul.f32 %v1055_v63, %v1052_v56 }
 0x25f   : > { %v1057_v43 = vadd.f32 1.4214138, %v1056_v8 }
 0x261   : > { %v1058_v17 = vmul.f32 %v1057_v43, %v1052_v56 }
 0x263   : > { %v1059_v27 = vadd.f32 -0.28449672, %v1058_v17 }
 0x265   : > { %v1060_v23 = vmul.f32 %v1059_v27, %v1052_v56 }
 0x267   : > { %v1061_v7 = vadd.f32 0.2548296, %v1060_v23 }
 0x269   : > { %v1062_v55 = vmul.f32 %v1061_v7, %v1052_v56 }
 0x26b   : > { %v1067_v0 = vmul.f32 %v1481_v20, %v1062_v55 }
 0x26d   : > { %v1068_v52 = vsub.f32 1.0, %v1067_v0 }
 0x26f   : > { %v1070_v39 = vsub.f32 0.0, %v1068_v52 }
 0x271   : > { %v1071_v18 = vsel %vm1069_vm14, %v1070_v39, %v1068_v52 }
 0x272   : > { %v1072_v19 = vadd.f32 1.0, %v1071_v18 }
 0x274   : > { %v1073_v1 = vmul.f32 %v1072_v19, %v1034_v40 }
 0x276   : > { %1110 = vmatmul.f32.vlgmr.msra.gmra.mxu3 %v1073_v1 }
 0x2f9   : > { %v1111_v25 = vpop.f32.mrf.mxu3 }
 0x2fa   : > { %v1112_v37 = vadd.f32 %v1445_v16, %v1111_v25 }
 0x2fc   : > { %1114 = vst [vmem:[%s1922_s17] sm:$0xff] %v1112_v37 }
 0x2fd   : > { %1115 = vst [vmem:[%s1931_s21] sm:$0xff] %v1112_v37 }
 0x2fe   : > { %1569 = shalt.err (!%p1566_p3)
}
 0x2ff   : > { %1337 = dma.vmem_to_hbm [thread:$0]  (%p1826_p11), %s1132_s22, 128, %s1134_s9, %s1117_s19  }
 0x300 PF: > { %s2512_s17 = sld [smem:[#allocation12_spill]]  ;;  %p1351_p1 = scmp.ge.s32.totalorder %s1668_s23, 2 }
 0x302   : > { %p1347_p7 = pnand %p1351_p1, %p1830_p13 }
 0x304   : > { %p1348_p2 = pneg %p1347_p7 }
 0x306   : > { %s1145_s21 = sand.u32 1, %s2512_s17  }
 0x307   : > { %s1146_s7 = scalar_lea.sflag [#allocation5], %s1145_s21 }
 0x308   : > { %1623 = dma.done.wait (%p1348_p2), %s1146_s7, 128  }
 0x309   : > { %1625 = vsyncadd (%p1348_p2), %s1146_s7, 4294967168  ;;  %s29_s23 = sadd.s32 1, %s1668_s23   ;;  %s2514_s16 = sld [smem:[#allocation13_spill]] }
 0x30a   : > { %p26_p6 = scmp.ge.s32.totalorder %s29_s23, 6   ;;  %s2515_s17 = sld [smem:[#allocation14_spill]] }
 0x30b   : > { %s2516_s18 = sld [smem:[#allocation21_spill]]  ;;  %s2521_s13 = smov %s1632_s14 }
 0x30c   : > { %s2517_s19 = sld [smem:[#allocation15_spill]]  ;;  %s2522_s14 = smov %s1636_s15 }
 0x30d   : > { %s2518_s20 = sld [smem:[#allocation16_spill]]  ;;  %s2523_s15 = smov %s1858_s10 }
 0x30e   : > { %s2519_s21 = sld [smem:[#allocation17_spill]]  ;;  %28 = sbr.rel (!%p26_p6) target bundleno = 19 (0x13), region = 136 }
 0x30f   : > { %s2520_s22 = sld [smem:[#allocation18_spill]] }
 0x313   :  { %1152 = vsyncpa [#allocation4], 1 }
 0x314   :  { %1154 = vsyncpa [#allocation4 + $0x1], 1 }
 0x315   :  { %1155 = vsyncpa [#allocation7], 1 }
 0x316   :  { %1157 = vsyncpa [#allocation7 + $0x1], 1 }
 0x317   :  { %1158 = vsyncpa [#allocation5], 1 }
 0x318   :  { %1160 = vsyncpa [#allocation5 + $0x1], 1 }

</bundles_post_ra>
